<compile_context>
chip_gen: v6e
topology: v6e:2x2x1
jax: 0.10.0
libtpu: 0.0.40
codegen_flags: <defaults>
</compile_context>

<pallas_src>
import functools

import jax
import jax.numpy as jnp
from jax import lax
from jax.experimental import pallas as pl
from jax.experimental.pallas import tpu as pltpu


def _round_up(x, m):
    return (x + m - 1) // m * m


def _vmem_budget_bytes():
    """VMEM budget per generation: ~48 MiB on 64 MiB parts, 64 MiB on 128 MiB."""
    cap = 128 * 1024 * 1024
    try:
        cap = int(pltpu.get_tpu_info().vmem_capacity_bytes)
    except Exception:
        pass
    return max(min(cap - 16 * 1024 * 1024, 64 * 1024 * 1024), 16 * 1024 * 1024)


def _pick_m_tile(m, k_dim, c_out, budget):
    """Largest M tile (pass 1) dividing m that fits the VMEM budget."""
    for t in (2048, 1024, 512, 256, 128):
        if m % t != 0:
            continue
        need = (2 * k_dim * t * 2          # double-buffered bf16 patch tiles
                + 2 * c_out * t * 2        # double-buffered bf16 conv tiles
                + 2 * c_out * k_dim * 2    # weight buffers (constant index)
                + (1 << 20))               # stats + slack
        if need <= budget:
            return t
    return 128


def _pick_hw_tile(hwp, c_out, budget):
    """Largest per-image HW tile (pass 2) dividing hwp that fits the budget."""
    for t in (2048, 1024, 512, 256, 128):
        if hwp % t != 0:
            continue
        need = 2 * c_out * t * 2 + 2 * c_out * t * 4 + (1 << 20)
        if need <= budget:
            return t
    return 128


# ----------------------------- Pallas kernels -------------------------------

def _gemm_stats_kernel(w_ref, p_ref, conv_ref, sum_ref, ssq_ref):
    """One M-tile of the conv GEMM + per-tile per-channel BN statistics.

    w_ref:    (C_out, K)   bf16  weight matrix (constant index_map)
    p_ref:    (K, tm)      bf16  im2col patches, transposed (lanes = M)
    conv_ref: (C_out, tm)  bf16  lane-dense conv output tile
    sum_ref:  (C_out, 1)   f32   this tile's per-channel sum
    ssq_ref:  (C_out, 1)   f32   this tile's per-channel sum of squares
    """
    y = jnp.dot(w_ref[...], p_ref[...], preferred_element_type=jnp.float32)
    # Statistics from the f32 accumulator BEFORE the bf16 downcast.
    sum_ref[...] = jnp.sum(y, axis=1, keepdims=True)
    ssq_ref[...] = jnp.sum(y * y, axis=1, keepdims=True)
    conv_ref[...] = y.astype(conv_ref.dtype)


def _bn_lrelu_kernel(conv_ref, scale_ref, shift_ref, o_ref, *, negative_slope):
    """Folded-BN scale/shift + LeakyReLU on one (C_out, thw) tile -> NCHW block.

    conv_ref:  (C_out, thw)     bf16
    scale_ref: (C_out, 1)       f32
    shift_ref: (C_out, 1)       f32
    o_ref:     (1, C_out, thw)  f32
    """
    z = conv_ref[...].astype(jnp.float32) * scale_ref[...] + shift_ref[...]
    o_ref[...] = jnp.where(z > 0, z, negative_slope * z)[None]


# ------------------------------ host wrapper --------------------------------

def _im2col_reflect(x, kernel_size, stride):
    """x: (N, C, H, W) -> patches (C*k*k, N, Ho*Wo)  [K on sublanes]."""
    n, c, h, w = x.shape
    k = kernel_size
    xp = jnp.pad(x, ((0, 0), (0, 0), (1, 1), (1, 1)), mode="reflect")
    hp, wp = h + 2, w + 2
    ho = (hp - k) // stride + 1
    wo = (wp - k) // stride + 1
    slices = []
    for kh in range(k):
        for kw in range(k):
            slices.append(
                xp[:, :, kh: kh + stride * (ho - 1) + 1: stride,
                          kw: kw + stride * (wo - 1) + 1: stride])
    patches = jnp.stack(slices, axis=0)                # (k*k, N, C, Ho, Wo)
    patches = jnp.transpose(patches, (2, 0, 1, 3, 4))  # (C, k*k, N, Ho, Wo)
    patches = patches.reshape(c * k * k, n, ho * wo)   # (K, N, Ho*Wo)
    return patches, ho, wo


def conv_block_forward(x, weight, gamma, beta, *, stride,
                       eps=1e-5, negative_slope=0.2):
    """x: (N, C_in, H, W) NCHW.  weight: (C_out, C_in, 4, 4).  Returns NCHW f32."""
    n, c_in, h, w = x.shape
    c_out, _, k, _ = weight.shape

    # bf16 MXU operands (f32 accumulation inside the kernel).
    x_bf = x.astype(jnp.bfloat16)
    w_mat = weight.reshape(c_out, c_in * k * k).astype(jnp.bfloat16)  # (C_out, K)

    patches, ho, wo = _im2col_reflect(x_bf, k, stride)                # (K, N, HW)
    k_dim = patches.shape[0]
    hw = ho * wo
    # Pad the spatial axis PER IMAGE to a lane multiple: zero columns give a
    # zero conv output (no bias) -> contribute 0 to sum/ssq; we divide by the
    # true element count, so BN statistics stay exact.
    hwp = _round_up(hw, 128)
    if hwp != hw:
        patches = jnp.pad(patches, ((0, 0), (0, 0), (0, hwp - hw)))
    m = n * hwp
    patches = patches.reshape(k_dim, m)                               # (K, M)

    budget = _vmem_budget_bytes()
    tm = _pick_m_tile(m, k_dim, c_out, budget)
    n_m_tiles = m // tm
    thw = _pick_hw_tile(hwp, c_out, budget)
    n_hw_tiles = hwp // thw

    # ---- pass 1: conv GEMM (bf16 store) + per-tile BN partial statistics ----
    conv_bf, part_sum, part_ssq = pl.pallas_call(
        _gemm_stats_kernel,
        out_shape=(
            jax.ShapeDtypeStruct((c_out, m), jnp.bfloat16),
            jax.ShapeDtypeStruct((c_out, n_m_tiles), jnp.float32),
            jax.ShapeDtypeStruct((c_out, n_m_tiles), jnp.float32),
        ),
        grid_spec=pltpu.PrefetchScalarGridSpec(
            num_scalar_prefetch=0,
            grid=(n_m_tiles,),
            in_specs=[
                pl.BlockSpec((c_out, k_dim), lambda i: (0, 0)),
                pl.BlockSpec((k_dim, tm), lambda i: (0, i)),
            ],
            out_specs=[
                pl.BlockSpec((c_out, tm), lambda i: (0, i)),
                pl.BlockSpec((c_out, 1), lambda i: (0, i)),
                pl.BlockSpec((c_out, 1), lambda i: (0, i)),
            ],
        ),
        compiler_params=pltpu.CompilerParams(
            dimension_semantics=("parallel",),   # megacore-shardable (v7x)
            vmem_limit_bytes=budget),
    )(w_mat, patches)

    # ---- per-channel scale/shift from the partial stats (O(C_out) work) ----
    m_true = jnp.float32(n * hw)                      # true count (ignores pad)
    ch_sum = jnp.sum(part_sum, axis=1)
    ch_ssq = jnp.sum(part_ssq, axis=1)
    mean = ch_sum / m_true
    var = jnp.maximum(ch_ssq / m_true - mean * mean, 0.0)   # biased variance
    inv = lax.rsqrt(var + eps)
    g32 = gamma.astype(jnp.float32)
    b32 = beta.astype(jnp.float32)
    scale = (g32 * inv).reshape(c_out, 1)
    shift = (b32 - mean * g32 * inv).reshape(c_out, 1)

    # ---- pass 2: BN-apply + LeakyReLU, writing the NCHW layout directly ----
    bn_kernel = functools.partial(_bn_lrelu_kernel,
                                  negative_slope=negative_slope)
    y = pl.pallas_call(
        bn_kernel,
        out_shape=jax.ShapeDtypeStruct((n, c_out, hwp), jnp.float32),
        grid_spec=pltpu.PrefetchScalarGridSpec(
            num_scalar_prefetch=0,
            grid=(n, n_hw_tiles),
            in_specs=[
                pl.BlockSpec((c_out, thw),
                             lambda b, j: (0, b * n_hw_tiles + j)),
                pl.BlockSpec((c_out, 1), lambda b, j: (0, 0)),
                pl.BlockSpec((c_out, 1), lambda b, j: (0, 0)),
            ],
            out_specs=pl.BlockSpec((1, c_out, thw), lambda b, j: (b, 0, j)),
        ),
        compiler_params=pltpu.CompilerParams(
            dimension_semantics=("parallel", "parallel"),
            vmem_limit_bytes=budget),
    )(conv_bf, scale, shift)

    # No transpose needed: output is already (N, C_out, HW); drop spatial pad.
    if hwp != hw:
        y = y[:, :, :hw]
    return y.reshape(n, c_out, ho, wo)


# ------------------------------ reference (JAX) ------------------------------

def conv_block_reference(x, weight, gamma, beta, *, stride,
                         eps=1e-5, negative_slope=0.2,
                         conv_dtype=jnp.float32):
    xp = jnp.pad(x, ((0, 0), (0, 0), (1, 1), (1, 1)), mode="reflect")
    y = lax.conv_general_dilated(
        xp.astype(conv_dtype), weight.astype(conv_dtype),
        window_strides=(stride, stride), padding="VALID",
        dimension_numbers=("NCHW", "OIHW", "NCHW"),
        preferred_element_type=jnp.float32)
    mean = jnp.mean(y, axis=(0, 2, 3), keepdims=True)
    var = jnp.mean((y - mean) ** 2, axis=(0, 2, 3), keepdims=True)
    z = (y - mean) * lax.rsqrt(var + eps)
    z = z * gamma.reshape(1, -1, 1, 1) + beta.reshape(1, -1, 1, 1)
    return jnp.where(z > 0, z, negative_slope * z)


# ----------------------------------- main ------------------------------------

if __name__ == "__main__":
    key = jax.random.PRNGKey(0)
    k_x, k_w, k_g, k_b = jax.random.split(key, 4)

    in_channels, out_channels, stride = 4, 8, 2
    batch, spatial = 2, 16

    x = jax.random.normal(k_x, (batch, in_channels, spatial, spatial),
                          dtype=jnp.float32)
    fan_in = in_channels * 4 * 4
    weight = jax.random.normal(
        k_w, (out_channels, in_channels, 4, 4),
        dtype=jnp.float32) / jnp.sqrt(fan_in)
    # Slightly perturbed BN affine so scale/shift are actually exercised.
    gamma = 1.0 + 0.1 * jax.random.normal(k_g, (out_channels,), jnp.float32)
    beta = 0.1 * jax.random.normal(k_b, (out_channels,), jnp.float32)

    out = conv_block_forward(x, weight, gamma, beta, stride=stride)
    out = jax.block_until_ready(out)

    # Reference matched to the kernel's bf16 MXU operands (f32 accumulate).
    # Tolerances account for the bf16 storage of the conv intermediate
    # (~2^-9 relative rounding before normalization).
    ref_bf16 = conv_block_reference(x, weight, gamma, beta, stride=stride,
                                    conv_dtype=jnp.bfloat16)
    # Exact f32 (PyTorch semantics) reference — looser tol due to bf16 inputs.
    ref_f32 = conv_block_reference(x, weight, gamma, beta, stride=stride,
                                   conv_dtype=jnp.float32)

    assert out.shape == ref_f32.shape == (batch, out_channels,
                                          spatial // 2, spatial // 2)
    assert jnp.allclose(out, ref_bf16, atol=2e-2, rtol=2e-2), \
        "mismatch vs bf16-matched reference"
    assert jnp.allclose(out, ref_f32, atol=6e-2, rtol=6e-2), \
        "mismatch vs fp32 reference"

    print("KERNEL_OK")
</pallas_src>

<mosaic_0001>
module attributes {stable_mosaic.version = 11 : i64} {
  func.func @_gemm_stats_kernel(%arg0: i32, %arg1: memref<8x64xbf16, #tpu.memory_space<vmem>>, %arg2: memref<64x256xbf16, #tpu.memory_space<vmem>>, %arg3: memref<8x256xbf16, #tpu.memory_space<vmem>>, %arg4: memref<8x1xf32, #tpu.memory_space<vmem>>, %arg5: memref<8x1xf32, #tpu.memory_space<vmem>>) attributes {dimension_semantics = [#tpu.dimension_semantics<parallel>], iteration_bounds = array<i64: 1>, scalar_prefetch = 0 : i64, scratch_operands = 0 : i64, tpu.core_type = #tpu.core_type<tc>, window_params = [{pipeline_mode = #tpu.pipeline_mode<synchronous>, transform_indices = @transform_0, window_bounds = array<i64: 8, 64>}, {transform_indices = @transform_1, window_bounds = array<i64: 64, 256>}, {transform_indices = @transform_2, window_bounds = array<i64: 8, 256>}, {transform_indices = @transform_3, window_bounds = array<i64: 8, 1>}, {transform_indices = @transform_4, window_bounds = array<i64: 8, 1>}]} {
    %c0 = arith.constant 0 : index
    %c0_0 = arith.constant 0 : index
    %0 = vector.load %arg1[%c0, %c0_0] : memref<8x64xbf16, #tpu.memory_space<vmem>>, vector<8x64xbf16>
    %c0_1 = arith.constant 0 : index
    %c0_2 = arith.constant 0 : index
    %1 = vector.load %arg2[%c0_1, %c0_2] : memref<64x256xbf16, #tpu.memory_space<vmem>>, vector<64x256xbf16>
    %cst = arith.constant dense<0.000000e+00> : vector<8x256xf32>
    %2 = tpu.matmul %0, %1, %cst {dimension_numbers = #tpu.dot_dimension_numbers<[1], [0], [0], [1], [0, 0, 1, 1], [], []>} : vector<8x64xbf16>, vector<64x256xbf16>, vector<8x256xf32> -> vector<8x256xf32>
    %cst_3 = arith.constant dense<0.000000e+00> : vector<8xf32>
    %3 = vector.multi_reduction <add>, %2, %cst_3 [1] : vector<8x256xf32> to vector<8xf32>
    %4 = vector.shape_cast %3 : vector<8xf32> to vector<8x1xf32>
    %c0_4 = arith.constant 0 : index
    %c0_5 = arith.constant 0 : index
    %5 = vector.load %arg4[%c0_4, %c0_5] : memref<8x1xf32, #tpu.memory_space<vmem>>, vector<8x1xf32>
    tpu.vector_store %arg4[%c0_4, %c0_5], %4 {strides = array<i32>} : memref<8x1xf32, #tpu.memory_space<vmem>>, vector<8x1xf32>,
    %6 = arith.mulf %2, %2 : vector<8x256xf32>
    %cst_6 = arith.constant dense<0.000000e+00> : vector<8xf32>
    %7 = vector.multi_reduction <add>, %6, %cst_6 [1] : vector<8x256xf32> to vector<8xf32>
    %8 = vector.shape_cast %7 : vector<8xf32> to vector<8x1xf32>
    %c0_7 = arith.constant 0 : index
    %c0_8 = arith.constant 0 : index
    %9 = vector.load %arg5[%c0_7, %c0_8] : memref<8x1xf32, #tpu.memory_space<vmem>>, vector<8x1xf32>
    tpu.vector_store %arg5[%c0_7, %c0_8], %8 {strides = array<i32>} : memref<8x1xf32, #tpu.memory_space<vmem>>, vector<8x1xf32>,
    %10 = arith.truncf %2 : vector<8x256xf32> to vector<8x256xbf16>
    %c0_9 = arith.constant 0 : index
    %c0_10 = arith.constant 0 : index
    %11 = vector.load %arg3[%c0_9, %c0_10] : memref<8x256xbf16, #tpu.memory_space<vmem>>, vector<8x256xbf16>
    tpu.vector_store %arg3[%c0_9, %c0_10], %10 {strides = array<i32>} : memref<8x256xbf16, #tpu.memory_space<vmem>>, vector<8x256xbf16>,
    return
  }
  func.func @transform_0(%arg0: i32) -> (i32, i32) {
    %c0_i32 = arith.constant 0 : i32
    %c0_i32_0 = arith.constant 0 : i32
    %c0_i32_1 = arith.constant 0 : i32
    return %c0_i32, %c0_i32_0 : i32, i32
  }
  func.func @transform_1(%arg0: i32) -> (i32, i32) {
    %c0_i32 = arith.constant 0 : i32
    %c0_i32_0 = arith.constant 0 : i32
    return %c0_i32, %arg0 : i32, i32
  }
  func.func @transform_2(%arg0: i32) -> (i32, i32) {
    %c0_i32 = arith.constant 0 : i32
    %c0_i32_0 = arith.constant 0 : i32
    return %c0_i32, %arg0 : i32, i32
  }
  func.func @transform_3(%arg0: i32) -> (i32, i32) {
    %c0_i32 = arith.constant 0 : i32
    %c0_i32_0 = arith.constant 0 : i32
    return %c0_i32, %arg0 : i32, i32
  }
  func.func @transform_4(%arg0: i32) -> (i32, i32) {
    %c0_i32 = arith.constant 0 : i32
    %c0_i32_0 = arith.constant 0 : i32
    return %c0_i32, %arg0 : i32, i32
  }
}

</mosaic_0001>

<bundles_post_ra>
// kernel: tpu_custom_call.1
= control target key start
LH: loop header
LB: loop body
LE: loop exit
PB: predicated region body
PF: predicated region fallthrough
CT: control target
= control target key end

     0   :  { %10 = vsyncpa [#allocation3], 0  ;;  %s321_s0 = inlined_call_operand.hbm [shape: bf16[8,64], index: 0, kind: input, shape index: {}]   ;;  %s322_s1 = inlined_call_operand.hbm [shape: bf16[64,256], index: 1, kind: input, shape index: {}]   ;;  %s323_s2 = inlined_call_operand.hbm [shape: bf16[8,256], index: 2, kind: output, shape index: {0}]   ;;  %s324_s3 = inlined_call_operand.vmem [shape: f32[8,1], index: 3, kind: output, shape index: {1}]   ;;  %s325_s4 = inlined_call_operand.vmem [shape: f32[8,1], index: 4, kind: output, shape index: {2}]  }
   0x1   :  { %11 = vsyncpa [#allocation6], 0 }
   0x2   :  { %12 = vsyncpa [#allocation4], 0  ;;  %s275_s15 = smov [#allocation2]   ;;  %s276_s17 = smov [#allocation5]  }
   0x3   :  { %s19_s16 = sshll.u32 %s275_s15, 4  ;;  %s28_s18 = sshll.u32 %s276_s17, 4  ;;  %s20_s16 = int_to_ptr.vmem [resolvable:$true] %s19_s16  ;;  %s29_s18 = int_to_ptr.vmem [resolvable:$true] %s28_s18 }
   0x4   :  { %s217_s19 = scalar_lea.vmem %s20_s16, 64  ;;  %p222_p1 = scmp.lt.s32.totalorder %s20_s16, %s20_s16 }
   0x5   :  { %p218_p0 = scmp.ne.s32.totalorder %s20_s16, %s217_s19  ;;  %p223_p2 = scmp.lt.s32.totalorder %s217_s19, %s217_s19 }
   0x7   :  { %p224_p3 = por %p223_p2, %p222_p1 }
   0x9   :  { %p225_p4 = pnand %p224_p3, %p218_p0 }
   0xb   :  { %228 = shalt.err (!%p225_p4)
}
   0xc   :  { %22 = dma.hbm_to_vmem [thread:$0]  %s321_s0, 64, %s20_s16, [#allocation3]  }
   0xd   :  { %s237_s22 = scalar_lea.vmem %s29_s18, 1024  ;;  %p242_p6 = scmp.lt.s32.totalorder %s29_s18, %s29_s18 }
   0xe   :  { %p238_p5 = scmp.ne.s32.totalorder %s29_s18, %s237_s22  ;;  %p243_p7 = scmp.lt.s32.totalorder %s237_s22, %s237_s22 }
  0x10   :  { %p244_p8 = por %p243_p7, %p242_p6 }
  0x12   :  { %p245_p9 = pnand %p244_p8, %p238_p5 }
  0x14   :  { %248 = shalt.err (!%p245_p9)
}
  0x15   :  { %s277_s23 = smov 128   ;;  %s278_s24 = smov 8  }
  0x16   :  { %34 = dma.hbm_to_vmem [thread:$0]  %s322_s1, 1024, %s29_s18, [#allocation6], %s277_s23, %s277_s23, %s278_s24  }
  0x17   :  { %269 = dma.done.wait [#allocation3], 64  }
  0x18   :  { %270 = vsyncadd [#allocation3], 4294967232 }
  0x19   :  { %271 = dma.done.wait [#allocation6], 1024  }
  0x1a   :  { %272 = vsyncadd [#allocation6], 4294966272  ;;  %v279_v0 = vmov 0   ;;  %v197_v1 = vld [vmem:[#allocation5 + $0x34] ss:$8 sps:$4 sm:$0xff]   ;;  %vm91_vm0 = vcmask 523264  }
  0x1b   :  { %127 = vmatprep.mubr.bf16.mxu0 %v279_v0  ;;  %v199_v2 = vld [vmem:[#allocation5 + $0x30] ss:$8 sps:$4 sm:$0xff]   ;;  %103 = vmatprep.subr.bf16.mxu0 %v197_v1  ;;  %v200_v3 = vld [vmem:[#allocation5 + $0x24] ss:$8 sps:$4 sm:$0xff]   ;;  %v202_v4 = vld [vmem:[#allocation5 + $0x20] ss:$8 sps:$4 sm:$0xff]  }
  0x1c   :  { %104 = vmatpush1.bf16.msra.mxu0 %v199_v2  ;;  %v203_v5 = vld [vmem:[#allocation5 + $0x14] ss:$8 sps:$4 sm:$0xff]   ;;  %v205_v6 = vld [vmem:[#allocation5 + $0x10] ss:$8 sps:$4 sm:$0xff]   ;;  %v206_v7 = vld [vmem:[#allocation5 + $0x4] ss:$8 sps:$4 sm:$0xff]  }
  0x1d   :  { %105 = vmatprep.subr.bf16.mxu0 %v200_v3  ;;  %v208_v8 = vld [vmem:[#allocation5] ss:$8 sps:$4 sm:$0xff]   ;;  %v42_v9 = vld [vmem:[#allocation2] sm:$0xf]  ;;  %s280_s0 = smov [#allocation7]  }
  0x1e   :  { %s162_s1 = sshll.u32 %s280_s0, 4  ;;  %s163_s1 = int_to_ptr.vmem [resolvable:$true] %s162_s1 }
  0x1f   :  { %s249_s27 = scalar_lea.vmem %s163_s1, 128  ;;  %p254_p11 = scmp.lt.s32.totalorder %s163_s1, %s163_s1 }
  0x20   :  { %106 = vmatpush1.bf16.msra.mxu0 %v202_v4  ;;  %p250_p10 = scmp.ne.s32.totalorder %s163_s1, %s249_s27  ;;  %p255_p12 = scmp.lt.s32.totalorder %s249_s27, %s249_s27 }
  0x21   :  { %107 = vmatprep.subr.bf16.mxu0 %v203_v5 }
  0x22   :  { %p256_p13 = por %p255_p12, %p254_p11 }
  0x24   :  { %108 = vmatpush1.bf16.msra.mxu0 %v205_v6  ;;  %p257_p0 = pnand %p256_p13, %p250_p10 }
  0x25   :  { %109 = vmatprep.subr.bf16.mxu0 %v206_v7 }
  0x28   :  { %110 = vmatpush1.bf16.msra.mxu0 %v208_v8 }
  0x2b   :  { %188 = vmatmul.mubr.msk.bf16.vlgmr.msra.gmra.mxu0 %vm91_vm0, %v42_v9 }
  0xeb   :  { %v129_v10 = vpop.f32.mrf.mxu0 }
  0xec   :  { %v141_v16 = vmul.f32 %v129_v10, %v129_v10 }
  0xed   :  { %v131_v11 = vpop.f32.mrf.mxu0 }
  0xee   :  { %v190_v12 = vpack.c.bf16 %v131_v11, %v129_v10  ;;  %v136_v13 = vadd.f32 %v131_v11, %v129_v10  ;;  %v142_v14 = vmul.f32 %v131_v11, %v131_v11 }
  0xef   :  { %v133_v15 = vpop.f32.mrf.mxu0 }
  0xf0   :  { %155 = vst [vmem:[#allocation7] sm:$0xff] %v190_v12  ;;  %137 = vadd.xlane.f32.xlu0 %v136_v13  ;;  %v143_v18 = vadd.f32 %v142_v14, %v141_v16 }
  0xf1   :  { %v134_v17 = vpop.f32.mrf.mxu0 }
  0xf4   :  { %144 = vadd.xlane.f32.xlu0 %v143_v18 }
  0xf5   :  { %260 = shalt.err (!%p257_p0)
}
  0xf6   :  { %165 = dma.vmem_to_hbm [thread:$0]  %s163_s1, 128, %s323_s2, [#allocation4]   ;;  %vm139_vm1 = vcmask 7168  }
 0x179   :  { %v138_v19 = vpop.xlane.xlu0 %137 }
 0x17a   :  { %140 = vst.msk [vmem:[%s324_s3] sm:$0xff] %vm139_vm1, %v138_v19 }
 0x17d   :  { %v145_v20 = vpop.xlane.xlu0 %144 }
 0x17e   :  { %146 = vst.msk [vmem:[%s325_s4] sm:$0xff] %vm139_vm1, %v145_v20 }
 0x17f   :  { %273 = dma.done.wait [#allocation4], 128  }
 0x180   :  { %274 = vsyncadd [#allocation4], 4294967168 }
 0x181   :  { %177 = vsyncpa [#allocation3], 1 }
 0x182   :  { %178 = vsyncpa [#allocation6], 1 }
 0x183   :  { %179 = vsyncpa [#allocation4], 1 }

</bundles_post_ra>
